<compile_context>
chip_gen: v6e
topology: v6e:2x2x1
jax: 0.10.0
libtpu: 0.0.40
codegen_flags: <defaults>
</compile_context>

<pallas_src>
import jax
import jax.numpy as jnp
from jax.experimental import pallas as pl
from jax.experimental.pallas import tpu as pltpu


def block_kernel(x_ref, w_ref, b_ref, gamma_ref, beta_ref, o_ref, acc_ref):
    k = pl.program_id(1)

    @pl.when(k == 0)
    def _():
        acc_ref[...] = jnp.zeros_like(acc_ref)

    # (B, TK) @ (TK, TN) on the MXU: bf16 operands, f32 accumulation.
    acc_ref[...] += jnp.dot(x_ref[...], w_ref[...],
                            preferred_element_type=jnp.float32)

    @pl.when(k == pl.num_programs(1) - 1)
    def _():
        y = acc_ref[...] + b_ref[...]
        # LeakyReLU, PyTorch default slope 0.01
        z = jnp.where(y > 0, y, 0.01 * y)
        # BatchNorm1d (training mode): batch stats over axis 0, biased variance.
        # One-pass moments: var = E[z^2] - mean^2 (no centered temporary).
        inv_n = 1.0 / z.shape[0]
        mean = jnp.sum(z, axis=0, keepdims=True) * inv_n
        ex2 = jnp.sum(z * z, axis=0, keepdims=True) * inv_n
        var = jnp.maximum(ex2 - mean * mean, 0.0)
        inv_std = jax.lax.rsqrt(var + 1e-5)           # EUP slot -> ~free
        # Fold BN affine into a single per-feature scale/shift.
        scale = gamma_ref[...] * inv_std
        shift = beta_ref[...] - mean * scale
        o_ref[...] = z * scale + shift


def _round_up(x, m):
    return ((x + m - 1) // m) * m


_TILE_CANDS = (2048, 1536, 1024, 768, 512, 256)


def _vmem_bytes():
    try:
        return int(pltpu.get_tpu_info().vmem_capacity_bytes)
    except Exception:
        return 64 << 20   # conservative fallback: v7x per-TensorCore VMEM


def _tile_footprint(B, tk, tn):
    # double-buffered bf16 x/w tiles + double-buffered f32 out tile
    # + f32 accumulator + double-buffered per-feature vectors.
    return (2 * B * tk * 2 + 2 * tk * tn * 2
            + 2 * B * tn * 4 + B * tn * 4 + 2 * 3 * tn * 4)


def _pick_tiles(B, in_pad, out_pad, budget):
    # Largest (tn, tk) that divide the padded dims and fit the VMEM budget.
    for tn in _TILE_CANDS:
        if out_pad % tn:
            continue
        for tk in _TILE_CANDS:
            if in_pad % tk:
                continue
            if _tile_footprint(B, tk, tn) <= budget:
                return tn, tk
    return 256, 256   # minimum legal tiles (dims are padded to 256 multiples)


@jax.jit
def block_forward(x, w, b, gamma, beta):
    """x: (B, In) f32; w: (Out, In) f32 (PyTorch layout); b/gamma/beta: (Out,)."""
    B, In = x.shape
    Out = w.shape[0]

    # Pad feature dims to multiples of 256 (fills the 256x256 MXU on v6e/v7x;
    # harmless on v5e).  Zero padding is exact: padded K columns contribute 0
    # to the matmul and padded Out features pass through LeakyReLU/BN as finite
    # zeros and are sliced off below.  Batch is NOT padded (would corrupt the
    # batch statistics); the batch block always covers the full array dim.
    in_pad = _round_up(In, 256)
    out_pad = _round_up(Out, 256)
    if in_pad != In:
        x = jnp.pad(x, ((0, 0), (0, in_pad - In)))
        w = jnp.pad(w, ((0, 0), (0, in_pad - In)))
    if out_pad != Out:
        w = jnp.pad(w, ((0, out_pad - Out), (0, 0)))
        b = jnp.pad(b, (0, out_pad - Out))
        gamma = jnp.pad(gamma, (0, out_pad - Out))
        beta = jnp.pad(beta, (0, out_pad - Out))

    # bf16 operands (halves the HBM weight/activation stream, 2-4x MXU
    # throughput); the kernel accumulates in f32.  One-time transpose to
    # (In, Out) keeps the MXU in its native (K, N) orientation every step.
    x_bf = x.astype(jnp.bfloat16)
    w_t = w.T.astype(jnp.bfloat16)

    b2 = b.reshape(1, out_pad)
    g2 = gamma.reshape(1, out_pad)
    be2 = beta.reshape(1, out_pad)

    phys_vmem = _vmem_bytes()
    budget = phys_vmem // 2          # leave half for compiler temps / pipelining
    tn, tk = _pick_tiles(B, in_pad, out_pad, budget)

    # Megacore (v7x shards the "parallel" axis across 2 TensorCores): if one
    # Out tile would cover the whole output, split it so grid[0] >= 2 while
    # keeping the tile a multiple of 256.  Negligible cost on 1-TC chips.
    if out_pad // tn == 1 and tn % 512 == 0:
        tn //= 2

    grid = (out_pad // tn, in_pad // tk)

    vmem_limit = int(min(phys_vmem - (4 << 20),
                         max(2 * _tile_footprint(B, tk, tn), 32 << 20)))

    cost = pl.CostEstimate(
        flops=2 * B * in_pad * out_pad,
        transcendentals=out_pad,     # one rsqrt per feature
        bytes_accessed=(2 * (grid[0] * B * in_pad + in_pad * out_pad)
                        + 4 * (3 * out_pad + B * out_pad)),
    )

    out = pl.pallas_call(
        block_kernel,
        out_shape=jax.ShapeDtypeStruct((B, out_pad), jnp.float32),
        grid_spec=pltpu.PrefetchScalarGridSpec(
            num_scalar_prefetch=0,
            grid=grid,
            in_specs=[
                pl.BlockSpec((B, tk), lambda j, k: (0, k)),    # x   (bf16)
                pl.BlockSpec((tk, tn), lambda j, k: (k, j)),   # w.T (bf16)
                pl.BlockSpec((1, tn), lambda j, k: (0, j)),    # bias
                pl.BlockSpec((1, tn), lambda j, k: (0, j)),    # gamma
                pl.BlockSpec((1, tn), lambda j, k: (0, j)),    # beta
            ],
            out_specs=pl.BlockSpec((B, tn), lambda j, k: (0, j)),
            scratch_shapes=[pltpu.VMEM((B, tn), jnp.float32)],
        ),
        compiler_params=pltpu.CompilerParams(
            dimension_semantics=("parallel", "arbitrary"),
            vmem_limit_bytes=vmem_limit,
        ),
        cost_estimate=cost,
    )(x_bf, w_t, b2, g2, be2)

    return out[:, :Out]


def block_reference_f32(x, w, b, gamma, beta):
    y = x @ w.T + b
    z = jnp.where(y > 0, y, 0.01 * y)
    mean = jnp.mean(z, axis=0, keepdims=True)
    var = jnp.mean((z - mean) ** 2, axis=0, keepdims=True)
    return gamma * (z - mean) / jnp.sqrt(var + 1e-5) + beta


def block_reference_bf16(x, w, b, gamma, beta):
    # Matches the kernel's bf16-operand / f32-accumulate matmul.
    y = jnp.dot(x.astype(jnp.bfloat16), w.T.astype(jnp.bfloat16),
                preferred_element_type=jnp.float32) + b
    z = jnp.where(y > 0, y, 0.01 * y)
    mean = jnp.mean(z, axis=0, keepdims=True)
    var = jnp.mean((z - mean) ** 2, axis=0, keepdims=True)
    return gamma * (z - mean) / jnp.sqrt(var + 1e-5) + beta


def _make_inputs(key, B, In, Out):
    kx, kw, kb = jax.random.split(key, 3)
    x = jax.random.normal(kx, (B, In), dtype=jnp.float32)
    bound = 1.0 / jnp.sqrt(jnp.float32(In))
    w = jax.random.uniform(kw, (Out, In), minval=-bound, maxval=bound,
                           dtype=jnp.float32)
    b = jax.random.uniform(kb, (Out,), minval=-bound, maxval=bound,
                           dtype=jnp.float32)
    gamma = jnp.ones((Out,), jnp.float32)   # BatchNorm1d default weight
    beta = jnp.zeros((Out,), jnp.float32)   # BatchNorm1d default bias
    return x, w, b, gamma, beta


if __name__ == "__main__":
    # (B, In, Out): small module-consistent shape; an unaligned shape that
    # exercises padding + the split "parallel" Out axis; and a shape whose
    # padded In (1280) forces a multi-tile K reduction (grid = (2, 5)).
    shapes = [(8, 32, 64), (16, 300, 320), (16, 1200, 320)]
    for i, (B, IN, OUT) in enumerate(shapes):
        args = _make_inputs(jax.random.PRNGKey(i), B, IN, OUT)
        out = jax.block_until_ready(block_forward(*args))
        assert out.shape == (B, OUT)

        ref16 = block_reference_bf16(*args)   # bf16-matched reference (tight)
        err16 = float(jnp.max(jnp.abs(out - ref16)))
        assert jnp.allclose(out, ref16, atol=2e-3, rtol=2e-3), \
            f"bf16-matched mismatch at {(B, IN, OUT)}: max |err| = {err16}"

        ref32 = block_reference_f32(*args)    # f32 semantics sanity check (loose)
        err32 = float(jnp.max(jnp.abs(out - ref32)))
        assert jnp.allclose(out, ref32, atol=1e-1, rtol=1e-1), \
            f"f32 reference mismatch at {(B, IN, OUT)}: max |err| = {err32}"

    print("KERNEL_OK")
</pallas_src>

<mosaic_0001>
module attributes {stable_mosaic.version = 11 : i64} {
  func.func @block_kernel(%arg0: i32, %arg1: i32, %arg2: memref<8x256xbf16, #tpu.memory_space<vmem>>, %arg3: memref<256x256xbf16, #tpu.memory_space<vmem>>, %arg4: memref<1x256xf32, #tpu.memory_space<vmem>>, %arg5: memref<1x256xf32, #tpu.memory_space<vmem>>, %arg6: memref<1x256xf32, #tpu.memory_space<vmem>>, %arg7: memref<8x256xf32, #tpu.memory_space<vmem>>, %arg8: memref<8x256xf32, #tpu.memory_space<vmem>>) attributes {dimension_semantics = [#tpu.dimension_semantics<parallel>, #tpu.dimension_semantics<arbitrary>], iteration_bounds = array<i64: 1, 1>, scalar_prefetch = 0 : i64, scratch_operands = 1 : i64, tpu.core_type = #tpu.core_type<tc>, window_params = [{transform_indices = @transform_0, window_bounds = array<i64: 8, 256>}, {transform_indices = @transform_1, window_bounds = array<i64: 256, 256>}, {transform_indices = @transform_2, window_bounds = array<i64: 1, 256>}, {transform_indices = @transform_3, window_bounds = array<i64: 1, 256>}, {transform_indices = @transform_4, window_bounds = array<i64: 1, 256>}, {transform_indices = @transform_5, window_bounds = array<i64: 8, 256>}]} {
    %c0_i32 = arith.constant 0 : i32
    %0 = arith.cmpi eq, %arg1, %c0_i32 : i32
    %1 = arith.extui %0 : i1 to i32
    %c0_i32_0 = arith.constant 0 : i32
    %2 = arith.cmpi ne, %1, %c0_i32_0 : i32
    scf.if %2 {
      %cst_10 = arith.constant 0.000000e+00 : f32
      %12 = vector.broadcast %cst_10 : f32 to vector<8x256xf32>
      %c0_11 = arith.constant 0 : index
      %c0_12 = arith.constant 0 : index
      %13 = vector.load %arg8[%c0_11, %c0_12] : memref<8x256xf32, #tpu.memory_space<vmem>>, vector<8x256xf32>
      tpu.vector_store %arg8[%c0_11, %c0_12], %12 {strides = array<i32>} : memref<8x256xf32, #tpu.memory_space<vmem>>, vector<8x256xf32>,
    } else {
    }
    %c0 = arith.constant 0 : index
    %c0_1 = arith.constant 0 : index
    %3 = vector.load %arg8[%c0, %c0_1] : memref<8x256xf32, #tpu.memory_space<vmem>>, vector<8x256xf32>
    %c0_2 = arith.constant 0 : index
    %c0_3 = arith.constant 0 : index
    %4 = vector.load %arg2[%c0_2, %c0_3] : memref<8x256xbf16, #tpu.memory_space<vmem>>, vector<8x256xbf16>
    %c0_4 = arith.constant 0 : index
    %c0_5 = arith.constant 0 : index
    %5 = vector.load %arg3[%c0_4, %c0_5] : memref<256x256xbf16, #tpu.memory_space<vmem>>, vector<256x256xbf16>
    %cst = arith.constant dense<0.000000e+00> : vector<8x256xf32>
    %6 = tpu.matmul %4, %5, %cst {dimension_numbers = #tpu.dot_dimension_numbers<[1], [0], [0], [1], [0, 0, 1, 1], [], []>} : vector<8x256xbf16>, vector<256x256xbf16>, vector<8x256xf32> -> vector<8x256xf32>
    %7 = arith.addf %3, %6 : vector<8x256xf32>
    %c0_6 = arith.constant 0 : index
    %c0_7 = arith.constant 0 : index
    %8 = vector.load %arg8[%c0_6, %c0_7] : memref<8x256xf32, #tpu.memory_space<vmem>>, vector<8x256xf32>
    tpu.vector_store %arg8[%c0_6, %c0_7], %7 {strides = array<i32>} : memref<8x256xf32, #tpu.memory_space<vmem>>, vector<8x256xf32>,
    %c0_i32_8 = arith.constant 0 : i32
    %9 = arith.cmpi eq, %arg1, %c0_i32_8 : i32
    %10 = arith.extui %9 : i1 to i32
    %c0_i32_9 = arith.constant 0 : i32
    %11 = arith.cmpi ne, %10, %c0_i32_9 : i32
    scf.if %11 {
      %c0_10 = arith.constant 0 : index
      %c0_11 = arith.constant 0 : index
      %12 = vector.load %arg8[%c0_10, %c0_11] : memref<8x256xf32, #tpu.memory_space<vmem>>, vector<8x256xf32>
      %c0_12 = arith.constant 0 : index
      %c0_13 = arith.constant 0 : index
      %13 = vector.load %arg4[%c0_12, %c0_13] : memref<1x256xf32, #tpu.memory_space<vmem>>, vector<1x256xf32>
      %14 = vector.broadcast %13 : vector<1x256xf32> to vector<8x256xf32>
      %15 = arith.addf %12, %14 : vector<8x256xf32>
      %cst_14 = arith.constant 0.000000e+00 : f32
      %16 = vector.broadcast %cst_14 : f32 to vector<8x256xf32>
      %17 = arith.cmpf ogt, %15, %16 : vector<8x256xf32>
      %cst_15 = arith.constant 0.00999999977 : f32
      %18 = vector.broadcast %cst_15 : f32 to vector<8x256xf32>
      %19 = arith.mulf %18, %15 : vector<8x256xf32>
      %20 = arith.select %17, %15, %19 : vector<8x256xi1>, vector<8x256xf32>
      %cst_16 = arith.constant dense<0.000000e+00> : vector<256xf32>
      %21 = vector.multi_reduction <add>, %20, %cst_16 [0] : vector<8x256xf32> to vector<256xf32>
      %22 = vector.shape_cast %21 : vector<256xf32> to vector<1x256xf32>
      %cst_17 = arith.constant 1.250000e-01 : f32
      %23 = vector.broadcast %cst_17 : f32 to vector<1x256xf32>
      %24 = arith.mulf %22, %23 : vector<1x256xf32>
      %25 = arith.mulf %20, %20 : vector<8x256xf32>
      %cst_18 = arith.constant dense<0.000000e+00> : vector<256xf32>
      %26 = vector.multi_reduction <add>, %25, %cst_18 [0] : vector<8x256xf32> to vector<256xf32>
      %27 = vector.shape_cast %26 : vector<256xf32> to vector<1x256xf32>
      %cst_19 = arith.constant 1.250000e-01 : f32
      %28 = vector.broadcast %cst_19 : f32 to vector<1x256xf32>
      %29 = arith.mulf %27, %28 : vector<1x256xf32>
      %30 = arith.mulf %24, %24 : vector<1x256xf32>
      %31 = arith.subf %29, %30 : vector<1x256xf32>
      %cst_20 = arith.constant 0.000000e+00 : f32
      %32 = vector.broadcast %cst_20 : f32 to vector<1x256xf32>
      %33 = arith.maximumf %31, %32 : vector<1x256xf32>
      %cst_21 = arith.constant 9.99999974E-6 : f32
      %34 = vector.broadcast %cst_21 : f32 to vector<1x256xf32>
      %35 = arith.addf %33, %34 : vector<1x256xf32>
      %36 = math.rsqrt %35 : vector<1x256xf32>
      %c0_22 = arith.constant 0 : index
      %c0_23 = arith.constant 0 : index
      %37 = vector.load %arg5[%c0_22, %c0_23] : memref<1x256xf32, #tpu.memory_space<vmem>>, vector<1x256xf32>
      %38 = arith.mulf %37, %36 : vector<1x256xf32>
      %c0_24 = arith.constant 0 : index
      %c0_25 = arith.constant 0 : index
      %39 = vector.load %arg6[%c0_24, %c0_25] : memref<1x256xf32, #tpu.memory_space<vmem>>, vector<1x256xf32>
      %40 = arith.mulf %24, %38 : vector<1x256xf32>
      %41 = arith.subf %39, %40 : vector<1x256xf32>
      %42 = vector.broadcast %38 : vector<1x256xf32> to vector<8x256xf32>
      %43 = arith.mulf %20, %42 : vector<8x256xf32>
      %44 = vector.broadcast %41 : vector<1x256xf32> to vector<8x256xf32>
      %45 = arith.addf %43, %44 : vector<8x256xf32>
      %c0_26 = arith.constant 0 : index
      %c0_27 = arith.constant 0 : index
      %46 = vector.load %arg7[%c0_26, %c0_27] : memref<8x256xf32, #tpu.memory_space<vmem>>, vector<8x256xf32>
      tpu.vector_store %arg7[%c0_26, %c0_27], %45 {strides = array<i32>} : memref<8x256xf32, #tpu.memory_space<vmem>>, vector<8x256xf32>,
    } else {
    }
    return
  }
  func.func @transform_0(%arg0: i32, %arg1: i32) -> (i32, i32) {
    %c0_i32 = arith.constant 0 : i32
    %c0_i32_0 = arith.constant 0 : i32
    return %c0_i32, %arg1 : i32, i32
  }
  func.func @transform_1(%arg0: i32, %arg1: i32) -> (i32, i32) {
    %c0_i32 = arith.constant 0 : i32
    return %arg1, %arg0 : i32, i32
  }
  func.func @transform_2(%arg0: i32, %arg1: i32) -> (i32, i32) {
    %c0_i32 = arith.constant 0 : i32
    %c0_i32_0 = arith.constant 0 : i32
    return %c0_i32, %arg0 : i32, i32
  }
  func.func @transform_3(%arg0: i32, %arg1: i32) -> (i32, i32) {
    %c0_i32 = arith.constant 0 : i32
    %c0_i32_0 = arith.constant 0 : i32
    return %c0_i32, %arg0 : i32, i32
  }
  func.func @transform_4(%arg0: i32, %arg1: i32) -> (i32, i32) {
    %c0_i32 = arith.constant 0 : i32
    %c0_i32_0 = arith.constant 0 : i32
    return %c0_i32, %arg0 : i32, i32
  }
  func.func @transform_5(%arg0: i32, %arg1: i32) -> (i32, i32) {
    %c0_i32 = arith.constant 0 : i32
    %c0_i32_0 = arith.constant 0 : i32
    return %c0_i32, %arg0 : i32, i32
  }
}

</mosaic_0001>

<bundles_post_ra>
// kernel: block_forward.1
= control target key start
LH: loop header
LB: loop body
LE: loop exit
PB: predicated region body
PF: predicated region fallthrough
CT: control target
= control target key end

     0   :  { %v280_v35 = vlaneseq  ;;  %s668_s1 = inlined_call_operand.vmem [shape: bf16[256,256], index: 1, kind: input, shape index: {}]   ;;  %s669_s0 = inlined_call_operand.vmem [shape: bf16[8,256], index: 0, kind: input, shape index: {}]   ;;  %s670_s2 = inlined_call_operand.vmem [shape: f32[1,256], index: 2, kind: input, shape index: {}]   ;;  %s671_s3 = inlined_call_operand.vmem [shape: f32[1,256], index: 3, kind: input, shape index: {}]   ;;  %s672_s4 = inlined_call_operand.vmem [shape: f32[1,256], index: 4, kind: input, shape index: {}]   ;;  %s673_s5 = inlined_call_operand.vmem [shape: f32[8,256], index: 5, kind: output, shape index: {}]  }
   0x1   :  { %v447_v0 = vld [vmem:[%s668_s1 + $0x74] ss:$8 sps:$4 sm:$0xff]   ;;  %v449_v1 = vld [vmem:[%s668_s1 + $0x70] ss:$8 sps:$4 sm:$0xff]   ;;  %v450_v2 = vld [vmem:[%s668_s1 + $0x64] ss:$8 sps:$4 sm:$0xff]  }
   0x2   :  { %228 = vmatprep.subr.bf16.mxu0 %v447_v0  ;;  %v452_v3 = vld [vmem:[%s668_s1 + $0x60] ss:$8 sps:$4 sm:$0xff]   ;;  %v453_v4 = vld [vmem:[%s668_s1 + $0x54] ss:$8 sps:$4 sm:$0xff]   ;;  %v455_v5 = vld [vmem:[%s668_s1 + $0x50] ss:$8 sps:$4 sm:$0xff]  }
   0x3   :  { %229 = vmatpush1.bf16.msra.mxu0 %v449_v1  ;;  %v456_v6 = vld [vmem:[%s668_s1 + $0x44] ss:$8 sps:$4 sm:$0xff]   ;;  %v458_v7 = vld [vmem:[%s668_s1 + $0x40] ss:$8 sps:$4 sm:$0xff]   ;;  %v459_v8 = vld [vmem:[%s668_s1 + $0x34] ss:$8 sps:$4 sm:$0xff]  }
   0x4   :  { %230 = vmatprep.subr.bf16.mxu0 %v450_v2  ;;  %v461_v9 = vld [vmem:[%s668_s1 + $0x30] ss:$8 sps:$4 sm:$0xff]   ;;  %v462_v10 = vld [vmem:[%s668_s1 + $0x24] ss:$8 sps:$4 sm:$0xff]   ;;  %v464_v11 = vld [vmem:[%s668_s1 + $0x20] ss:$8 sps:$4 sm:$0xff]  }
   0x5   :  { %v465_v12 = vld [vmem:[%s668_s1 + $0x14] ss:$8 sps:$4 sm:$0xff]   ;;  %v28_v13 = vld [vmem:[%s669_s0] sm:$0xff]  ;;  %v467_v15 = vld [vmem:[%s668_s1 + $0x10] ss:$8 sps:$4 sm:$0xff]   ;;  %v631_v36 = vshrl.u32 %v280_v35, 7 }
   0x6   :  { %v413_v14 = vcombine.high %v28_v13, %v28_v13  ;;  %v468_v16 = vld [vmem:[%s668_s1 + $0x4] ss:$8 sps:$4 sm:$0xff]   ;;  %v470_v17 = vld [vmem:[%s668_s1] ss:$8 sps:$4 sm:$0xff]   ;;  %v471_v18 = vld [vmem:[%s668_s1 + $0xf4] ss:$8 sps:$4 sm:$0xff]   ;;  %v412_v34 = vcombine.low %v28_v13, %v28_v13 }
   0x7   :  { %231 = vmatpush1.bf16.msra.mxu0 %v452_v3  ;;  %v473_v19 = vld [vmem:[%s668_s1 + $0xf0] ss:$8 sps:$4 sm:$0xff]   ;;  %v474_v20 = vld [vmem:[%s668_s1 + $0xe4] ss:$8 sps:$4 sm:$0xff]   ;;  %v476_v21 = vld [vmem:[%s668_s1 + $0xe0] ss:$8 sps:$4 sm:$0xff]  }
   0x8   :  { %232 = vmatprep.subr.bf16.mxu0 %v453_v4  ;;  %260 = vmatprep.mubr.bf16.mxu0 %v413_v14  ;;  %v477_v22 = vld [vmem:[%s668_s1 + $0xd4] ss:$8 sps:$4 sm:$0xff]   ;;  %v479_v23 = vld [vmem:[%s668_s1 + $0xd0] ss:$8 sps:$4 sm:$0xff]   ;;  %v480_v24 = vld [vmem:[%s668_s1 + $0xc4] ss:$8 sps:$4 sm:$0xff]  }
   0x9   :  { %v482_v25 = vld [vmem:[%s668_s1 + $0xc0] ss:$8 sps:$4 sm:$0xff]   ;;  %v483_v26 = vld [vmem:[%s668_s1 + $0xb4] ss:$8 sps:$4 sm:$0xff]   ;;  %v485_v27 = vld [vmem:[%s668_s1 + $0xb0] ss:$8 sps:$4 sm:$0xff]  }
   0xa   :  { %v486_v28 = vld [vmem:[%s668_s1 + $0xa4] ss:$8 sps:$4 sm:$0xff]   ;;  %v488_v29 = vld [vmem:[%s668_s1 + $0xa0] ss:$8 sps:$4 sm:$0xff]   ;;  %v489_v30 = vld [vmem:[%s668_s1 + $0x94] ss:$8 sps:$4 sm:$0xff]  }
   0xb   :  { %233 = vmatpush1.bf16.msra.mxu0 %v455_v5  ;;  %v491_v31 = vld [vmem:[%s668_s1 + $0x90] ss:$8 sps:$4 sm:$0xff]   ;;  %v492_v32 = vld [vmem:[%s668_s1 + $0x84] ss:$8 sps:$4 sm:$0xff]   ;;  %v494_v33 = vld [vmem:[%s668_s1 + $0x80] ss:$8 sps:$4 sm:$0xff]  }
   0xc   :  { %234 = vmatprep.subr.bf16.mxu0 %v456_v6  ;;  %v634_v37 = vsub.s32 0, %v631_v36  ;;  %v278_v38 = vld [vmem:[%s670_s2] sm:$0x3]  ;;  %v640_v39 = vsub.s32 1, %v631_v36 }
   0xe   :  { %v283_v40 = vrot.slane %v278_v38, %v634_v37  ;;  %v287_v41 = vrot.slane %v278_v38, %v640_v39 }
   0xf   :  { %235 = vmatpush1.bf16.msra.mxu0 %v458_v7 }
  0x10   :  { %236 = vmatprep.subr.bf16.mxu0 %v459_v8 }
  0x13   :  { %237 = vmatpush1.bf16.msra.mxu0 %v461_v9 }
  0x14   :  { %238 = vmatprep.subr.bf16.mxu0 %v462_v10 }
  0x17   :  { %239 = vmatpush1.bf16.msra.mxu0 %v464_v11 }
  0x18   :  { %240 = vmatprep.subr.bf16.mxu0 %v465_v12 }
  0x1b   :  { %241 = vmatpush1.bf16.msra.mxu0 %v467_v15 }
  0x1c   :  { %242 = vmatprep.subr.bf16.mxu0 %v468_v16 }
  0x1f   :  { %243 = vmatpush1.bf16.msra.mxu0 %v470_v17 }
  0x20   :  { %244 = vmatprep.subr.bf16.mxu0 %v471_v18 }
  0x23   :  { %245 = vmatpush2.bf16.msra.mxu0 %v473_v19 }
  0x24   :  { %246 = vmatprep.subr.bf16.mxu0 %v474_v20 }
  0x27   :  { %247 = vmatpush2.bf16.msra.mxu0 %v476_v21 }
  0x28   :  { %248 = vmatprep.subr.bf16.mxu0 %v477_v22 }
  0x2b   :  { %249 = vmatpush2.bf16.msra.mxu0 %v479_v23 }
  0x2c   :  { %250 = vmatprep.subr.bf16.mxu0 %v480_v24 }
  0x2f   :  { %251 = vmatpush2.bf16.msra.mxu0 %v482_v25 }
  0x30   :  { %252 = vmatprep.subr.bf16.mxu0 %v483_v26  ;;  %v501_v26 = vmov 1966171168  }
  0x33   :  { %253 = vmatpush2.bf16.msra.mxu0 %v485_v27  ;;  %v343_v27 = vunpack.c.l.s4 %v501_v26 }
  0x34   :  { %254 = vmatprep.subr.bf16.mxu0 %v486_v28 }
  0x35   :  { %v344_v28 = vunpack.c.0.s8 %v343_v27 }
  0x37   :  { %255 = vmatpush2.bf16.msra.mxu0 %v488_v29 }
  0x38   :  { %256 = vmatprep.subr.bf16.mxu0 %v489_v30  ;;  %v347_v30 = vsub.s32 %v344_v28, %v631_v36  ;;  %v358_v36 = vld [vmem:[%s672_s4] sm:$0x3] }
  0x3b   :  { %257 = vmatpush2.bf16.msra.mxu0 %v491_v31 }
  0x3c   :  { %258 = vmatprep.subr.bf16.mxu0 %v492_v32 }
  0x3f   :  { %259 = vmatpush2.bf16.msra.mxu0 %v494_v33 }
  0x42   :  { %261 = vmatmul.mubr.bf16.vlgmr.msra.gmra.mxu0 %v412_v34  ;;  %v338_v34 = vld [vmem:[%s671_s3] sm:$0x3] }
 0x102   :  { %v262_v42 = vpop.f32.mrf.mxu0 }
 0x103   :  { %v290_v43 = vadd.f32 %v283_v40, %v262_v42 }
 0x104   :  { %v264_v44 = vpop.f32.mrf.mxu0 }
 0x105   :  { %vm292_vm0 = vcmp.gt.f32.partialorder %v290_v43, 0.0  ;;  %v294_v45 = vmul.f32 0.01, %v290_v43  ;;  %v291_v46 = vadd.f32 %v287_v41, %v264_v44 }
 0x106   :  { %v266_v47 = vpop.f32.mrf.mxu0 }
 0x107   :  { %v644_v48 = vsel %vm292_vm0, %v290_v43, %v294_v45  ;;  %vm293_vm1 = vcmp.gt.f32.partialorder %v291_v46, 0.0  ;;  %v295_v49 = vmul.f32 0.01, %v291_v46 }
 0x108   :  { %v298_v50 = vrot.slane %v644_v48, 4  ;;  %v312_v51 = vmul.f32 %v644_v48, %v644_v48  ;;  %v267_v52 = vpop.f32.mrf.mxu0 }
 0x109   :  { %v297_v53 = vsel %vm293_vm1, %v291_v46, %v295_v49 }
 0x10a   :  { %v299_v54 = vadd.f32 %v298_v50, %v644_v48  ;;  %v314_v55 = vrot.slane %v312_v51, 4  ;;  %v304_v56 = vrot.slane %v297_v53, 4  ;;  %v313_v57 = vmul.f32 %v297_v53, %v297_v53 }
 0x10c   :  { %v300_v58 = vrot.slane %v299_v54, 2  ;;  %v315_v59 = vadd.f32 %v314_v55, %v312_v51  ;;  %v305_v60 = vadd.f32 %v304_v56, %v297_v53  ;;  %v320_v61 = vrot.slane %v313_v57, 4 }
 0x10e   :  { %v301_v62 = vadd.f32 %v300_v58, %v299_v54  ;;  %v316_v63 = vrot.slane %v315_v59, 2  ;;  %v306_v0 = vrot.slane %v305_v60, 2  ;;  %v321_v1 = vadd.f32 %v320_v61, %v313_v57 }
 0x110   :  { %v302_v2 = vrot.slane %v301_v62, 1  ;;  %v317_v3 = vadd.f32 %v316_v63, %v315_v59  ;;  %v307_v4 = vadd.f32 %v306_v0, %v305_v60  ;;  %v322_v5 = vrot.slane %v321_v1, 2 }
 0x112   :  { %v303_v6 = vadd.f32 %v302_v2, %v301_v62  ;;  %v318_v7 = vrot.slane %v317_v3, 1  ;;  %v308_v8 = vrot.slane %v307_v4, 1  ;;  %v323_v9 = vadd.f32 %v322_v5, %v321_v1 }
 0x114   :  { %v310_v10 = vmul.f32 0.125, %v303_v6  ;;  %v319_v11 = vadd.f32 %v318_v7, %v317_v3  ;;  %v309_v12 = vadd.f32 %v308_v8, %v307_v4  ;;  %v324_v13 = vrot.slane %v323_v9, 1 }
 0x116   :  { %v326_v14 = vmul.f32 0.125, %v319_v11  ;;  %v328_v15 = vmul.f32 %v310_v10, %v310_v10  ;;  %v311_v16 = vmul.f32 0.125, %v309_v12  ;;  %v325_v17 = vadd.f32 %v324_v13, %v323_v9 }
 0x118   :  { %v330_v18 = vsub.f32 %v326_v14, %v328_v15  ;;  %v327_v19 = vmul.f32 0.125, %v325_v17  ;;  %v329_v20 = vmul.f32 %v311_v16, %v311_v16 }
 0x11a   :  { %v332_v21 = vmax.f32 %v330_v18, 0.0  ;;  %v331_v22 = vsub.f32 %v327_v19, %v329_v20 }
 0x11c   :  { %v334_v23 = vadd.f32 1e-05, %v332_v21  ;;  %v333_v24 = vmax.f32 %v331_v22, 0.0 }
 0x11e   :  { %v335_v25 = vadd.f32 1e-05, %v333_v24  ;;  %497 = vrsqrt.f32 %v334_v23 }
 0x120   :  { %499 = vrsqrt.f32 %v335_v25 }
 0x12b   :  { %v498_v29 = vpop.eup %497 }
 0x12d   :  { %v500_v31 = vpop.eup %499 }
 0x12e   :  { %v341_v32 = vcombine.low %v498_v29, %v500_v31 }
 0x130   :  { %v348_v33 = vrot.slane %v341_v32, %v347_v30 }
 0x132   :  { %v355_v35 = vrot.slane %v348_v33, %v347_v30 }
 0x134   :  { %v357_v38 = vmul.f32 %v355_v35, %v338_v34 }
 0x136   :  { %v363_v40 = vrot.slane %v357_v38, %v634_v37  ;;  %v367_v41 = vrot.slane %v357_v38, %v640_v39 }
 0x138   :  { %v370_v42 = vmul.f32 %v363_v40, %v310_v10  ;;  %v371_v43 = vmul.f32 %v367_v41, %v311_v16  ;;  %v391_v49 = vmul.f32 %v363_v40, %v644_v48  ;;  %v392_v50 = vmul.f32 %v367_v41, %v297_v53 }
 0x13a   :  { %v374_v44 = vcombine.low %v370_v42, %v371_v43 }
 0x13c   :  { %v381_v45 = vrot.slane %v374_v44, %v347_v30 }
 0x13e   :  { %v388_v46 = vrot.slane %v381_v45, %v347_v30 }
 0x140   :  { %v390_v47 = vsub.f32 %v358_v36, %v388_v46 }
 0x142   :  { %v397_v51 = vrot.slane %v390_v47, %v634_v37  ;;  %v401_v52 = vrot.slane %v390_v47, %v640_v39 }
 0x144   :  { %v404_v54 = vadd.f32 %v397_v51, %v391_v49  ;;  %v405_v55 = vadd.f32 %v401_v52, %v392_v50 }
 0x146   :  { %406 = vst [vmem:[%s673_s5] sm:$0xff] %v404_v54  ;;  %407 = vst [vmem:[%s673_s5 + $0x8] sm:$0xff] %v405_v55 }

</bundles_post_ra>
